<compile_context>
chip_gen: v7x
topology: tpu7x:2x2x1
jax: 0.10.0
libtpu: 0.0.40
codegen_flags: <defaults>
</compile_context>

<pallas_src>
import functools

import numpy as np

import jax
import jax.numpy as jnp
from jax.experimental import pallas as pl
from jax.experimental.pallas import tpu as pltpu


_DEFAULT_MAX_BATCH_TILE = 512     # rows per output block (sublane axis)
_DEFAULT_MAX_CLASS_TILE = 4096    # classes per output block (lane axis)


def _multihot_kernel(idx_ref, out_ref, *, pad_value: int, needs_pad_mask: bool):
    """idx_ref: (bt, L) int32 padded indices; out_ref: (bt, TC) multihot tile."""
    bt, tc = out_ref.shape
    L = idx_ref.shape[1]

    if L == 0:
        out_ref[...] = jnp.zeros((bt, tc), out_ref.dtype)
        return

    idx = idx_ref[...]                                        # (bt, L) int32
    if needs_pad_mask:
        # padding_idx is a valid class id: remap padded entries to -1 once
        # over (bt, L) instead of an extra compare over the full (bt, L, TC).
        idx = jnp.where(idx == pad_value, jnp.int32(-1), idx)

    # Class ids covered by this lane-dense tile: [j*TC, (j+1)*TC).
    offset = pl.program_id(1) * tc
    class_ids = jax.lax.broadcasted_iota(jnp.int32, (bt, tc), 1) + offset

    # OR-accumulate over the index axis; static Python unroll keeps the loop
    # fully visible to the scheduler (L is small) and live set is just `acc`.
    acc = idx[:, 0:1] == class_ids                            # (bt, TC) bool
    for l in range(1, L):
        acc = acc | (idx[:, l:l + 1] == class_ids)

    out_ref[...] = acc.astype(out_ref.dtype)


@functools.lru_cache(maxsize=None)
def _bool_output_supported() -> bool:
    """Probe once whether this Pallas/Mosaic build supports bool kernel outputs."""
    def probe(o_ref):
        o_ref[...] = jax.lax.broadcasted_iota(jnp.int32, o_ref.shape, 1) < 64

    try:
        out = pl.pallas_call(
            probe,
            out_shape=jax.ShapeDtypeStruct((8, 128), jnp.bool_),
        )()
        out = jax.block_until_ready(out)
        expected = (jnp.arange(128) < 64)[None, :]
        return bool(jnp.all(out == expected))
    except Exception:
        return False


def indices_to_multihot_pallas(indices, num_classes, *, padding_idx=None,
                               dtype=jnp.bool_, batch_tile=None,
                               class_tile=None):
    """indices: int array (B, L), padded with padding_idx (or -1 if None)."""
    if dtype is None:
        dtype = jnp.bool_
    target_dtype = np.dtype(dtype)

    indices = jnp.asarray(indices, dtype=jnp.int32)
    B, L = indices.shape

    pad_value = -1 if padding_idx is None else int(padding_idx)
    # Only mask explicitly if the pad value could collide with a real class id.
    needs_pad_mask = padding_idx is not None and 0 <= pad_value < num_classes

    # --- Tile selection (respect the (8, 128) block rule) -------------------
    bt = B if batch_tile is None else min(int(batch_tile), B)
    bt = min(bt, _DEFAULT_MAX_BATCH_TILE)
    if bt != B and bt % 8 != 0:
        bt = max(8, (bt // 8) * 8)

    tc = num_classes if class_tile is None else min(int(class_tile), num_classes)
    tc = min(tc, _DEFAULT_MAX_CLASS_TILE)
    if tc != num_classes and tc % 128 != 0:
        tc = max(128, (tc // 128) * 128)

    grid = (pl.cdiv(B, bt), pl.cdiv(num_classes, tc))

    # --- Output dtype: emit directly from the kernel when supported ---------
    if target_dtype == np.dtype(np.bool_) and not _bool_output_supported():
        store_dtype = jnp.int8            # fallback: int8 store + XLA cast
    else:
        store_dtype = target_dtype

    kernel = functools.partial(
        _multihot_kernel, pad_value=pad_value, needs_pad_mask=needs_pad_mask)

    out = pl.pallas_call(
        kernel,
        out_shape=jax.ShapeDtypeStruct((B, num_classes), store_dtype),
        grid_spec=pltpu.PrefetchScalarGridSpec(
            num_scalar_prefetch=0,
            grid=grid,
            # Class axis is innermost: the (bt, L) index block keeps block
            # index (i, 0) across class tiles and is not re-DMA'd.
            in_specs=[pl.BlockSpec((bt, L), lambda i, j: (i, 0))],
            out_specs=pl.BlockSpec((bt, tc), lambda i, j: (i, j)),
        ),
        compiler_params=pltpu.CompilerParams(
            dimension_semantics=("parallel", "parallel"),
            vmem_limit_bytes=32 * 1024 * 1024,
        ),
    )(indices)

    if out.dtype != target_dtype:
        out = out.astype(target_dtype)
    return out


class IndicesToMultihot:
    """JAX/Pallas mirror of torchoutil.nn.IndicesToMultihot (no parameters)."""

    def __init__(self, num_classes, *, padding_idx=None, dtype=jnp.bool_,
                 batch_tile=None, class_tile=None):
        self.num_classes = num_classes
        self.padding_idx = padding_idx
        self.dtype = dtype
        self.batch_tile = batch_tile
        self.class_tile = class_tile

    def __call__(self, indices):
        return indices_to_multihot_pallas(
            indices, self.num_classes,
            padding_idx=self.padding_idx, dtype=self.dtype,
            batch_tile=self.batch_tile, class_tile=self.class_tile)


def _reference(indices, num_classes, padding_idx):
    pad_value = -1 if padding_idx is None else padding_idx
    onehot = indices[:, :, None] == jnp.arange(num_classes)[None, None, :]
    onehot = onehot & (indices[:, :, None] != pad_value)
    return jnp.any(onehot, axis=1)


if __name__ == "__main__":
    B, L = 16, 8
    num_classes = 256

    key = jax.random.PRNGKey(0)
    k_idx, k_mask = jax.random.split(key)
    base = jax.random.randint(k_idx, (B, L), 0, num_classes, dtype=jnp.int32)
    pad_mask = jax.random.uniform(k_mask, (B, L)) < 0.33

    # Case 1: padding_idx=None — ragged rows represented with a -1 filler.
    # Small tiles are forced so the 2-D (batch x class) grid is exercised.
    idx1 = jnp.where(pad_mask, jnp.int32(-1), base)
    out1 = indices_to_multihot_pallas(
        idx1, num_classes, padding_idx=None, dtype=jnp.bool_,
        batch_tile=8, class_tile=128)
    out1 = jax.block_until_ready(out1)
    ref1 = _reference(idx1, num_classes, None)
    assert out1.shape == (B, num_classes)
    assert out1.dtype == jnp.bool_
    assert bool(jnp.all(out1 == ref1))

    # Case 2: padding_idx is a valid class id (exercises the pad premask path),
    # via the module with default (auto) tiling.
    padding_idx = 0
    idx2 = jnp.where(pad_mask, jnp.int32(padding_idx), base)
    module = IndicesToMultihot(num_classes, padding_idx=padding_idx,
                               dtype=jnp.bool_)
    out2 = jax.block_until_ready(module(idx2))
    ref2 = _reference(idx2, num_classes, padding_idx)
    assert out2.shape == (B, num_classes)
    assert out2.dtype == jnp.bool_
    assert bool(jnp.all(out2 == ref2))

    # TODO(synk): host-side ragged List[List[int]] -> dense (B, L) packing is
    # done outside the kernel (no clean in-kernel equivalent for Python lists).
    print("KERNEL_OK")
</pallas_src>

<mosaic_0001>
module attributes {stable_mosaic.version = 11 : i64} {
  func.func @_multihot_kernel(%arg0: i32, %arg1: i32, %arg2: memref<8x8xi32, #tpu.memory_space<vmem>>, %arg3: memref<8x128xi8, #tpu.memory_space<vmem>>) attributes {dimension_semantics = [#tpu.dimension_semantics<parallel>, #tpu.dimension_semantics<parallel>], iteration_bounds = array<i64: 2, 2>, scalar_prefetch = 0 : i64, scratch_operands = 0 : i64, tpu.core_type = #tpu.core_type<tc>, window_params = [{transform_indices = @transform_0, window_bounds = array<i64: 8, 8>}, {transform_indices = @transform_1, window_bounds = array<i64: 8, 128>}]} {
    %c0 = arith.constant 0 : index
    %c0_0 = arith.constant 0 : index
    %0 = vector.load %arg2[%c0, %c0_0] : memref<8x8xi32, #tpu.memory_space<vmem>>, vector<8x8xi32>
    %c128_i32 = arith.constant 128 : i32
    %1 = arith.muli %arg1, %c128_i32 : i32
    %2 = tpu.iota {dimensions = array<i32: 1>} : vector<8x128xi32>
    %3 = vector.broadcast %1 : i32 to vector<8x128xi32>
    %4 = arith.addi %2, %3 : vector<8x128xi32>
    %5 = vector.extract_strided_slice %0 {offsets = [0, 0], sizes = [8, 1], strides = [1, 1]} : vector<8x8xi32> to vector<8x1xi32>
    %6 = vector.broadcast %5 : vector<8x1xi32> to vector<8x128xi32>
    %7 = arith.cmpi eq, %6, %4 : vector<8x128xi32>
    %8 = vector.extract_strided_slice %0 {offsets = [0, 1], sizes = [8, 1], strides = [1, 1]} : vector<8x8xi32> to vector<8x1xi32>
    %9 = vector.broadcast %8 : vector<8x1xi32> to vector<8x128xi32>
    %10 = arith.cmpi eq, %9, %4 : vector<8x128xi32>
    %11 = arith.ori %7, %10 : vector<8x128xi1>
    %12 = vector.extract_strided_slice %0 {offsets = [0, 2], sizes = [8, 1], strides = [1, 1]} : vector<8x8xi32> to vector<8x1xi32>
    %13 = vector.broadcast %12 : vector<8x1xi32> to vector<8x128xi32>
    %14 = arith.cmpi eq, %13, %4 : vector<8x128xi32>
    %15 = arith.ori %11, %14 : vector<8x128xi1>
    %16 = vector.extract_strided_slice %0 {offsets = [0, 3], sizes = [8, 1], strides = [1, 1]} : vector<8x8xi32> to vector<8x1xi32>
    %17 = vector.broadcast %16 : vector<8x1xi32> to vector<8x128xi32>
    %18 = arith.cmpi eq, %17, %4 : vector<8x128xi32>
    %19 = arith.ori %15, %18 : vector<8x128xi1>
    %20 = vector.extract_strided_slice %0 {offsets = [0, 4], sizes = [8, 1], strides = [1, 1]} : vector<8x8xi32> to vector<8x1xi32>
    %21 = vector.broadcast %20 : vector<8x1xi32> to vector<8x128xi32>
    %22 = arith.cmpi eq, %21, %4 : vector<8x128xi32>
    %23 = arith.ori %19, %22 : vector<8x128xi1>
    %24 = vector.extract_strided_slice %0 {offsets = [0, 5], sizes = [8, 1], strides = [1, 1]} : vector<8x8xi32> to vector<8x1xi32>
    %25 = vector.broadcast %24 : vector<8x1xi32> to vector<8x128xi32>
    %26 = arith.cmpi eq, %25, %4 : vector<8x128xi32>
    %27 = arith.ori %23, %26 : vector<8x128xi1>
    %28 = vector.extract_strided_slice %0 {offsets = [0, 6], sizes = [8, 1], strides = [1, 1]} : vector<8x8xi32> to vector<8x1xi32>
    %29 = vector.broadcast %28 : vector<8x1xi32> to vector<8x128xi32>
    %30 = arith.cmpi eq, %29, %4 : vector<8x128xi32>
    %31 = arith.ori %27, %30 : vector<8x128xi1>
    %32 = vector.extract_strided_slice %0 {offsets = [0, 7], sizes = [8, 1], strides = [1, 1]} : vector<8x8xi32> to vector<8x1xi32>
    %33 = vector.broadcast %32 : vector<8x1xi32> to vector<8x128xi32>
    %34 = arith.cmpi eq, %33, %4 : vector<8x128xi32>
    %35 = arith.ori %31, %34 : vector<8x128xi1>
    %36 = arith.extui %35 : vector<8x128xi1> to vector<8x128xi8>
    %c0_1 = arith.constant 0 : index
    %c0_2 = arith.constant 0 : index
    %37 = vector.load %arg3[%c0_1, %c0_2] : memref<8x128xi8, #tpu.memory_space<vmem>>, vector<8x128xi8>
    tpu.vector_store %arg3[%c0_1, %c0_2], %36 {strides = array<i32>} : memref<8x128xi8, #tpu.memory_space<vmem>>, vector<8x128xi8>,
    return
  }
  func.func @transform_0(%arg0: i32, %arg1: i32) -> (i32, i32) {
    %c0_i32 = arith.constant 0 : i32
    %c0_i32_0 = arith.constant 0 : i32
    return %arg0, %c0_i32 : i32, i32
  }
  func.func @transform_1(%arg0: i32, %arg1: i32) -> (i32, i32) {
    %c0_i32 = arith.constant 0 : i32
    return %arg0, %arg1 : i32, i32
  }
}

</mosaic_0001>

<bundles_post_ra>
// kernel: tpu_custom_call.1
= control target key start
LH: loop header
LB: loop body
LE: loop exit
PB: predicated region body
PF: predicated region fallthrough
CT: control target
= control target key end

     0   :  { %6 = vsyncpa [#allocation3], 0  ;;  %s619_s0 = inlined_call_operand.vmem [shape: s32[16,8], index: 0, kind: input, shape index: {}]   ;;  %s620_s1 = inlined_call_operand.hbm [shape: s8[16,256], index: 1, kind: output, shape index: {}]  }
   0x1   :  { %8 = vsyncpa [#allocation3 + $0x1], 0  ;;  %s481_s6 = smov 0   ;;  %s483_s7 = smov 0  }
   0x2   :  { %s485_s8 = smov 0   ;;  %s487_s9 = smov 0  }
   0x3   :  { %s489_s10 = smov 0   ;;  %s491_s11 = smov 0  }
   0x4   :  { %s493_s12 = smov 0   ;;  %s495_s13 = smov 0  }
   0x5 LB: > { %s265_s14 = sadd.s32 4294967295, %s460_s13   ;;  %s266_s15 = sadd.s32 4294967294, %s460_s13   ;;  %s460_s13 = sphi %s495_s13, %s14_s13   ;;  %s456_s12 = sphi %s493_s12, %s629_s12   ;;  %s452_s11 = sphi %s491_s11, %s628_s11   ;;  %s448_s10 = sphi %s489_s10, %s627_s10   ;;  %s444_s9 = sphi %s487_s9, %s626_s9   ;;  %s440_s8 = sphi %s485_s8, %s625_s8   ;;  %s436_s7 = sphi %s483_s7, %s624_s7   ;;  %s432_s6 = sphi %s481_s6, %s623_s6  }
   0x6   : > { %s23_s16 = sadd.s32 1, %s452_s11  ;;  %s26_s17 = sadd.s32 1, %s456_s12 }
   0x7   : > { %p24_p0 = scmp.ge.s32.totalorder %s23_s16, 2  ;;  %p71_p1 = scmp.ne.s32.totalorder %s440_s8, %s436_s7 }
   0x8   : > { %p72_p2 = scmp.eq.s32.totalorder %s265_s14, 3  ;;  %p77_p5 = scmp.ne.s32.totalorder %s436_s7, %s432_s6 }
   0x9   : > { %s631_s16 = smov (%p24_p0, %s23_s16), 0  ;;  %s633_s17 = smov (!%p24_p0, %s26_s17), %s456_s12 }
   0xa   : > { %s57_s18 = ssub.s32 %s452_s11, %s631_s16  ;;  %p532_p3 = por %p72_p2, %p71_p1 }
   0xb   : > { %p28_p4 = scmp.ge.s32.totalorder %s633_s17, 2  ;;  %p78_p6 = scmp.eq.s32.totalorder %s266_s15, 3 }
   0xc   : > { %p269_p7 = scmp.ge.s32.totalorder %s460_s13, 1  ;;  %p103_p9 = scmp.lt.s32.totalorder %s460_s13, 5 }
   0xd   : > { %s635_s17 = smov (%p28_p4, %s633_s17), 0  ;;  %p541_p8 = por %p78_p6, %p77_p5 }
   0xe   : > { %s56_s21 = ssub.s32 %s456_s12, %s635_s17  ;;  %s61_s22 = sadd.s32 1, %s440_s8 }
   0xf   : > { %s58_s23 = sor.u32 %s57_s18, %s56_s21  ;;  %p104_p10 = pnand %p269_p7, %p103_p9 }
  0x10   : > { %p59_p11 = scmp.eq.s32.totalorder %s58_s23, 0  ;;  %p122_p12 = scmp.lt.s32.totalorder (!%p104_p10), %s448_s10, 1  ;;  %v462_v0 = vmov (!%p104_p10), 2   ;;  %v463_v1 = vmov (!%p104_p10), 0   ;;  %v464_v3 = vmov (!%p104_p10), 3   ;;  %v465_v4 = vmov (!%p104_p10), 1  }
  0x11   : > { %107 = sbr.rel (%p104_p10) target bundleno = 196 (0xc4), region = 24  ;;  %359 = vset.pattern.permute.xlu1 (!%p104_p10), %v462_v0  ;;  %357 = vset.pattern.permute.xlu0 (!%p104_p10), %v463_v1  ;;  %v466_v5 = vmov (!%p104_p10), 4   ;;  %v467_v6 = vmov (!%p104_p10), 5   ;;  %v468_v7 = vmov (!%p104_p10), 6   ;;  %v469_v8 = vmov (!%p104_p10), 7   ;;  %s272_s30 = sshll.u32 (!%p104_p10), %s444_s9, 7 }
  0x12   : > { %s550_s24 = scalar_select %p59_p11, %s440_s8, %s61_s22  }
  0x13   : > { %v130_v9 = vlaneseq (!%p104_p10)  ;;  %v132_v13 = vstv (!%p104_p10), %s272_s30  ;;  %s119_s2 = sand.u32 (!%p104_p10), 1, %s436_s7   ;;  %s274_s4 = sshll.u32 (!%p104_p10), %s448_s10, 1 }
  0x14   : > { %s270_s3 = sshll.u32 (!%p104_p10), %s119_s2, 1  ;;  %s189_s5 = sadd.s32 (!%p104_p10), %s444_s9, %s274_s4 }
  0x15   : > { %v131_v12 = vand.u32 (!%p104_p10), 127, %v130_v9  ;;  %s275_s14 = sshll.u32 (!%p104_p10), %s189_s5, 5  ;;  %s121_s15 = scalar_lea.vmem (!%p104_p10), [#allocation2], %s270_s3 }
  0x16   : > { %s193_s18 = sshll.u32 (!%p104_p10), %s121_s15, 4  ;;  %s178_s9 = scalar_lea.sflag (!%p104_p10), [#allocation3], %s119_s2  ;;  %s567_s18 = int_to_ptr.vmem [resolvable:$true] %s193_s18 }
  0x17   : > { %v133_v14 = vadd.s32 (!%p104_p10), %v132_v13, %v131_v12  ;;  %s366_s23 = scalar_lea.vmem (!%p104_p10), %s567_s18, 32 }
  0x18   : > { %s123_s25 = scalar_select %p122_p12, %s448_s10, 1 }
  0x19   : > { %s565_s10 = scalar_lea.hbm %s620_s1, %s275_s14  ;;  %p367_p13 = scmp.ne.s32.totalorder %s567_s18, %s366_s23 }
  0x1a   : > { %s271_s26 = sshll.u32 %s123_s25, 3  ;;  %s470_s25 = smov [#allocation2]  }
  0x1b   : > { %s125_s29 = scalar_lea.vmem %s619_s0, %s271_s26  ;;  %p368_p0 = pnand %p367_p13, %p532_p3 }
  0x1c   : > { %v128_v2 = vld [vmem:[%s125_s29] sm:$0xff]  ;;  %s370_s26 = sshll.u32 %s470_s25, 4  ;;  %s371_s26 = int_to_ptr.vmem [resolvable:$false] %s370_s26 }
  0x1d   : > { %144 = vperm.xlu1 %359, %v128_v2   ;;  %135 = vperm.xlu0 %357, %v128_v2   ;;  %p369_p1 = pneg %p368_p0  ;;  %s372_s27 = scalar_lea.vmem %s371_s26, 64 }
  0x1e   : > { %p373_p2 = scmp.lt.s32.totalorder %s567_s18, %s371_s26  ;;  %p374_p4 = scmp.lt.s32.totalorder %s372_s27, %s366_s23 }
  0x20   : > { %p375_p5 = por %p374_p4, %p373_p2 }
  0x21   : > { %360 = vset.pattern.permute.xlu1 %v464_v3  ;;  %358 = vset.pattern.permute.xlu0 %v465_v4 }
  0x22   : > { %149 = vperm.xlu1 %360, %v128_v2   ;;  %139 = vperm.xlu0 %358, %v128_v2   ;;  %p376_p6 = pnand %p375_p5, %p369_p1 }
  0x26   : > { %361 = vset.pattern.permute.xlu1 %v466_v5  ;;  %362 = vset.pattern.permute.xlu0 %v467_v6 }
  0x27   : > { %154 = vperm.xlu1 %361, %v128_v2   ;;  %159 = vperm.xlu0 %362, %v128_v2  }
  0x2b   : > { %363 = vset.pattern.permute.xlu1 %v468_v7  ;;  %365 = vset.pattern.permute.xlu0 %v469_v8 }
  0x2c   : > { %164 = vperm.xlu1 %363, %v128_v2  }
  0x30   : > { %364 = vset.pattern.permute.xlu1 %v469_v8 }
  0x31   : > { %169 = vperm.xlu1 %364, %v128_v2  }
  0x9c   : > { %v145_v10 = vpop.permute.xlu1 %144  ;;  %v136_v11 = vpop.permute.xlu0 %135 }
  0x9d   : > { %vm137_vm0 = vcmp.eq.s32.totalorder %v136_v11, %v133_v14  ;;  %vm146_vm3 = vcmp.eq.s32.totalorder %v145_v10, %v133_v14 }
  0xa1   : > { %v150_v15 = vpop.permute.xlu1 %149  ;;  %v140_v16 = vpop.permute.xlu0 %139 }
  0xa2   : > { %vm141_vm1 = vcmp.eq.s32.totalorder %v140_v16, %v133_v14  ;;  %vm151_vm6 = vcmp.eq.s32.totalorder %v150_v15, %v133_v14 }
  0xa3   : > { %vm142_vm2 = vmor %vm137_vm0, %vm141_vm1 }
  0xa4   : > { %vm147_vm4 = vmor %vm142_vm2, %vm146_vm3 }
  0xa5   : > { %vm152_vm7 = vmor %vm147_vm4, %vm151_vm6 }
  0xa6   : > { %v155_v17 = vpop.permute.xlu1 %154  ;;  %v160_v18 = vpop.permute.xlu0 %159 }
  0xa7   : > { %vm156_vm5 = vcmp.eq.s32.totalorder %v155_v17, %v133_v14  ;;  %vm161_vm9 = vcmp.eq.s32.totalorder %v160_v18, %v133_v14 }
  0xa8   : > { %vm157_vm8 = vmor %vm152_vm7, %vm156_vm5 }
  0xa9   : > { %vm162_vm11 = vmor %vm157_vm8, %vm161_vm9 }
  0xab   : > { %v165_v19 = vpop.permute.xlu1 %164 }
  0xac   : > { %vm166_vm10 = vcmp.eq.s32.totalorder %v165_v19, %v133_v14 }
  0xad   : > { %vm167_vm12 = vmor %vm162_vm11, %vm166_vm10 }
  0xb0   : > { %v170_v20 = vpop.permute.xlu1 %169 }
  0xb1   : > { %vm171_vm13 = vcmp.eq.s32.totalorder %v170_v20, %v133_v14 }
  0xb2   : > { %vm172_vm14 = vmor %vm167_vm12, %vm171_vm13 }
  0xb3   : > { %vm173_vm15 = vmpackc.low %vm172_vm14, %vm172_vm14 }
  0xb4   : > { %vm174_vm0 = vmpackc.even %vm173_vm15, %vm173_vm15 }
  0xb5   : > { %v175_v21 = vsel %vm174_vm0, 16843009, %v463_v1 }
  0xb6   : > { %176 = vst [vmem:[%s121_s15] sm:$0x3] %v175_v21 }
  0xb7   : > { %379 = shalt.err (!%p376_p6)
}
  0xb8   : > { %s380_s28 = scalar_lea.hbm %s565_s10, 32  ;;  %s384_s2 = scalar_lea.hbm %s620_s1, 128 }
  0xb9   : > { %p381_p7 = scmp.ne.s32.totalorder %s565_s10, %s380_s28  ;;  %p385_p11 = scmp.lt.u32.totalorder %s565_s10, %s620_s1 }
  0xba   : > { %p386_p12 = scmp.lt.u32.totalorder %s384_s2, %s380_s28  ;;  %p388_p0 = scmp.lt.u32.totalorder %s380_s28, %s565_s10 }
  0xbb   : > { %p382_p9 = pnand %p381_p7, %p532_p3 }
  0xbc   : > { %p387_p13 = por %p386_p12, %p385_p11 }
  0xbd   : > { %p383_p10 = pneg %p382_p9 }
  0xbe   : > { %p389_p1 = por %p388_p0, %p387_p13 }
  0xc0   : > { %p390_p2 = pnand %p389_p1, %p383_p10 }
  0xc2   : > { %393 = shalt.err (!%p390_p2)
}
  0xc3   : > { %278 = dma.vmem_to_hbm [thread:$0]  (%p532_p3), %s567_s18, 32, %s565_s10, %s178_s9  }
  0xc4 PF: > { %p284_p4 = scmp.ge.s32.totalorder %s460_s13, 2  ;;  %s205_s5 = sand.u32 1, %s432_s6  }
  0xc5   : > { %s206_s14 = scalar_lea.sflag [#allocation3], %s205_s5 }
  0xc6   : > { %p281_p5 = pnand %p284_p4, %p541_p8 }
  0xc8   : > { %427 = dma.done.wait (!%p281_p5), %s206_s14, 32  }
  0xc9   : > { %429 = vsyncadd (!%p281_p5), %s206_s14, 4294967264  ;;  %s14_s13 = sadd.s32 1, %s460_s13   ;;  %s623_s6 = smov %s436_s7 }
  0xca   : > { %p11_p6 = scmp.ge.s32.totalorder %s14_s13, 6   ;;  %s624_s7 = smov %s440_s8 }
  0xcb   : > { %s625_s8 = smov %s550_s24  ;;  %s626_s9 = smov %s452_s11 }
  0xcc   : > { %s627_s10 = smov %s456_s12  ;;  %s628_s11 = smov %s631_s16 }
  0xcd   : > { %s629_s12 = smov %s635_s17  ;;  %13 = sbr.rel (!%p11_p6) target bundleno = 5 (0x5), region = 59 }
  0xd4   :  { %211 = vsyncpa [#allocation3], 1 }
  0xd5   :  { %213 = vsyncpa [#allocation3 + $0x1], 1 }

</bundles_post_ra>
